<compile_context>
chip_gen: v5e
topology: v5e:2x2
jax: 0.10.0
libtpu: 0.0.40
codegen_flags: <defaults>
</compile_context>

<pallas_src>
import functools

import jax
import jax.numpy as jnp
from jax.experimental import pallas as pl
from jax.experimental.pallas import tpu as pltpu


# ---------------------------------------------------------------------------
# Fast path (stride == 1): flat lane-slice formulation.
# ---------------------------------------------------------------------------
def _gated_conv_flat_kernel(x_ref, w_ref, b_ref, o_ref, *,
                            k, dilation, wp, h_out, c_out):
    """One batch element, stride==1.

    x_ref: (1, C_in_p, flat_len)        bf16  row-major flattened padded image
    w_ref: (k*k, 2*C_out, C_in_p)       bf16  fused [conv; mask] weights / tap
    b_ref: (2*C_out, 1)                 f32   fused biases
    o_ref: (1, C_out, h_out*Wp)         f32   lane-dense output (Wp-wide rows,
                                              columns >= W_out are garbage and
                                              sliced away in the wrapper)
    """
    x = x_ref[0]                                   # (C_in_p, flat_len)
    work = h_out * wp
    acc = jnp.zeros((2 * c_out, work), jnp.float32)
    for ki in range(k):
        for kj in range(k):
            off = (ki * wp + kj) * dilation        # static lane offset
            xs = x[:, off:off + work]              # (C_in_p, work) — no relayout
            acc = acc + jax.lax.dot_general(
                w_ref[ki * k + kj], xs, (((1,), (0,)), ((), ())),
                preferred_element_type=jnp.float32)
    acc = acc + b_ref[...]                         # bias, broadcast once
    conv = acc[:c_out]                             # sublane split at c_out
    mask = acc[c_out:]
    y = conv * jax.nn.sigmoid(mask)                # gate in f32 (EUP sigmoid)
    o_ref[0] = jnp.maximum(y, 0.2 * y).astype(o_ref.dtype)   # LeakyReLU(0.2)


def _call_flat(x, wf, bf, *, n, c_in_p, c_out, k, dilation,
               hp, wp, h_out, w_out):
    work = h_out * wp
    flat_needed = hp * wp + (k - 1) * dilation     # last tap over-reads this much
    flat_len = -(-flat_needed // 128) * 128        # lane-dense (multiple of 128)
    xf = x.reshape(n, c_in_p, hp * wp)             # free: HBM is row-major
    xf = jnp.pad(xf, ((0, 0), (0, 0), (0, flat_len - hp * wp)))

    # VMEM budget: double-buffered in/out blocks + weights + accumulator temps.
    bytes_in = 2 * c_in_p * flat_len * 2
    bytes_out = 2 * c_out * work * 4
    bytes_w = 2 * (k * k * 2 * c_out * c_in_p * 2 + 2 * c_out * 4)
    bytes_tmp = 4 * (2 * c_out * work * 4)
    vmem_limit = int(min(max(2 * (bytes_in + bytes_out + bytes_w + bytes_tmp),
                             32 * 1024 * 1024), 64 * 1024 * 1024))

    kernel = functools.partial(_gated_conv_flat_kernel, k=k, dilation=dilation,
                               wp=wp, h_out=h_out, c_out=c_out)
    out = pl.pallas_call(
        kernel,
        out_shape=jax.ShapeDtypeStruct((n, c_out, work), jnp.float32),
        grid_spec=pltpu.PrefetchScalarGridSpec(
            num_scalar_prefetch=0,
            grid=(n,),
            in_specs=[
                pl.BlockSpec((1, c_in_p, flat_len), lambda i: (i, 0, 0)),
                pl.BlockSpec((k * k, 2 * c_out, c_in_p), lambda i: (0, 0, 0)),
                pl.BlockSpec((2 * c_out, 1), lambda i: (0, 0)),
            ],
            out_specs=pl.BlockSpec((1, c_out, work), lambda i: (i, 0, 0)),
        ),
        compiler_params=pltpu.CompilerParams(
            dimension_semantics=("parallel",),     # v7x: shard batch over 2 TCs
            vmem_limit_bytes=vmem_limit),
    )(xf, wf, bf)
    # Free reshape (splits trailing dim), then drop the garbage columns.
    return out.reshape(n, c_out, h_out, wp)[:, :, :, :w_out]


# ---------------------------------------------------------------------------
# General fallback (stride > 1): per-tap strided slice + reshape (prev. rev).
# ---------------------------------------------------------------------------
def _gated_conv_general_kernel(x_ref, w_ref, b_ref, o_ref, *,
                               k, stride, dilation, h_out, w_out, c_out):
    x = x_ref[0]                                   # (C_in_p, Hp, Wp)
    hw = h_out * w_out
    acc = jnp.zeros((2 * c_out, hw), jnp.float32)
    for ki in range(k):
        for kj in range(k):
            i0 = ki * dilation
            j0 = kj * dilation
            xs = x[:,
                   i0:i0 + (h_out - 1) * stride + 1:stride,
                   j0:j0 + (w_out - 1) * stride + 1:stride]
            xs = xs.reshape(xs.shape[0], hw)
            acc = acc + jax.lax.dot_general(
                w_ref[ki * k + kj], xs, (((1,), (0,)), ((), ())),
                preferred_element_type=jnp.float32)
    acc = acc + b_ref[...]
    conv = acc[:c_out]
    mask = acc[c_out:]
    y = conv * jax.nn.sigmoid(mask)
    o_ref[0] = jnp.maximum(y, 0.2 * y).astype(o_ref.dtype)


def _call_general(x, wf, bf, *, n, c_in_p, c_out, k, stride, dilation,
                  hp, wp, h_out, w_out):
    hw = h_out * w_out
    bytes_in = 2 * c_in_p * hp * wp * 2
    bytes_out = 2 * c_out * hw * 4
    bytes_w = 2 * (k * k * 2 * c_out * c_in_p * 2 + 2 * c_out * 4)
    bytes_tmp = 4 * (2 * c_out * hw * 4)
    vmem_limit = int(min(max(2 * (bytes_in + bytes_out + bytes_w + bytes_tmp),
                             32 * 1024 * 1024), 64 * 1024 * 1024))
    kernel = functools.partial(_gated_conv_general_kernel, k=k, stride=stride,
                               dilation=dilation, h_out=h_out, w_out=w_out,
                               c_out=c_out)
    out = pl.pallas_call(
        kernel,
        out_shape=jax.ShapeDtypeStruct((n, c_out, hw), jnp.float32),
        grid_spec=pltpu.PrefetchScalarGridSpec(
            num_scalar_prefetch=0,
            grid=(n,),
            in_specs=[
                pl.BlockSpec((1, c_in_p, hp, wp), lambda i: (i, 0, 0, 0)),
                pl.BlockSpec((k * k, 2 * c_out, c_in_p), lambda i: (0, 0, 0)),
                pl.BlockSpec((2 * c_out, 1), lambda i: (0, 0)),
            ],
            out_specs=pl.BlockSpec((1, c_out, hw), lambda i: (i, 0, 0)),
        ),
        compiler_params=pltpu.CompilerParams(
            dimension_semantics=("parallel",),
            vmem_limit_bytes=vmem_limit),
    )(x, wf, bf)
    return out.reshape(n, c_out, h_out, w_out)


# ---------------------------------------------------------------------------
# Public entry point.
# ---------------------------------------------------------------------------
@functools.partial(jax.jit, static_argnames=("kernel_size", "stride",
                                             "padding", "dilation"))
def gated_conv2d(x, w_conv, b_conv, w_mask, b_mask, *,
                 kernel_size, stride=1, padding=0, dilation=1):
    """GatedConv2d forward.

    x:       (N, C_in, H, W)        NCHW float32
    w_conv:  (C_out, C_in, k, k)    torch Conv2d layout
    b_conv:  (C_out,)
    w_mask:  (C_out, C_in, k, k)
    b_mask:  (C_out,)
    returns: (N, C_out, H_out, W_out) float32
    """
    n, c_in, _, _ = x.shape
    c_out = w_conv.shape[0]
    k = kernel_size

    # Reflection pad (ReflectionPad2d == numpy 'reflect').
    if padding > 0:
        x = jnp.pad(x, ((0, 0), (0, 0), (padding, padding), (padding, padding)),
                    mode="reflect")
    hp, wp = x.shape[2], x.shape[3]
    h_out = (hp - dilation * (k - 1) - 1) // stride + 1
    w_out = (wp - dilation * (k - 1) - 1) // stride + 1

    # Pad C_in to a multiple of 8 (sublane-aligned contraction). Zero channels
    # are matched by zero weight rows, so the result is unchanged.
    c_pad = (-c_in) % 8
    if c_pad:
        x = jnp.pad(x, ((0, 0), (0, c_pad), (0, 0), (0, 0)))
    c_in_p = c_in + c_pad
    x = x.astype(jnp.bfloat16)                     # half the HBM bytes

    # Fused [conv; mask] weights -> (k*k, 2*C_out, C_in_p), taps indexed ki*k+kj.
    wf = jnp.concatenate([w_conv, w_mask], axis=0)  # (2C_out, C_in, k, k)
    if c_pad:
        wf = jnp.pad(wf, ((0, 0), (0, c_pad), (0, 0), (0, 0)))
    wf = wf.transpose(2, 3, 0, 1).reshape(k * k, 2 * c_out, c_in_p)
    wf = wf.astype(jnp.bfloat16)
    bf = jnp.concatenate([b_conv, b_mask]).reshape(2 * c_out, 1).astype(jnp.float32)

    if stride == 1:
        return _call_flat(x, wf, bf, n=n, c_in_p=c_in_p, c_out=c_out, k=k,
                          dilation=dilation, hp=hp, wp=wp,
                          h_out=h_out, w_out=w_out)
    # TODO(synk): stride>1 fallback keeps per-tap strided slices (relayouts);
    # a per-phase pre-subsampled flat layout would be faster.
    return _call_general(x, wf, bf, n=n, c_in_p=c_in_p, c_out=c_out, k=k,
                         stride=stride, dilation=dilation, hp=hp, wp=wp,
                         h_out=h_out, w_out=w_out)


# ---------------------------------------------------------------------------
# Pure-JAX f32 reference (lax.conv) for correctness check.
# ---------------------------------------------------------------------------
def _reference(x, w_conv, b_conv, w_mask, b_mask, *, kernel_size, stride,
               padding, dilation):
    if padding > 0:
        x = jnp.pad(x, ((0, 0), (0, 0), (padding, padding), (padding, padding)),
                    mode="reflect")
    dn = jax.lax.conv_dimension_numbers(x.shape, w_conv.shape,
                                        ("NCHW", "OIHW", "NCHW"))
    conv = jax.lax.conv_general_dilated(
        x, w_conv, (stride, stride), "VALID",
        rhs_dilation=(dilation, dilation), dimension_numbers=dn)
    conv = conv + b_conv.reshape(1, -1, 1, 1)
    mask = jax.lax.conv_general_dilated(
        x, w_mask, (stride, stride), "VALID",
        rhs_dilation=(dilation, dilation), dimension_numbers=dn)
    mask = mask + b_mask.reshape(1, -1, 1, 1)
    y = conv * jax.nn.sigmoid(mask)
    return jnp.where(y >= 0, y, 0.2 * y)


def _run_case(key, n, c_in, c_out, h, w, k, stride, pad, dil):
    k1, k2, k3, k4, k5 = jax.random.split(key, 5)
    x = jax.random.normal(k1, (n, c_in, h, w), dtype=jnp.float32)
    w_conv = jax.random.normal(k2, (c_out, c_in, k, k), dtype=jnp.float32) * 0.1
    b_conv = jax.random.normal(k3, (c_out,), dtype=jnp.float32) * 0.1
    w_mask = jax.random.normal(k4, (c_out, c_in, k, k), dtype=jnp.float32) * 0.1
    b_mask = jax.random.normal(k5, (c_out,), dtype=jnp.float32) * 0.1

    out = gated_conv2d(x, w_conv, b_conv, w_mask, b_mask,
                       kernel_size=k, stride=stride, padding=pad, dilation=dil)
    out = jax.block_until_ready(out)
    ref = _reference(x, w_conv, b_conv, w_mask, b_mask,
                     kernel_size=k, stride=stride, padding=pad, dilation=dil)
    assert out.shape == ref.shape, (out.shape, ref.shape)
    err = jnp.max(jnp.abs(out - ref))
    assert err < 5e-2, float(err)


if __name__ == "__main__":
    key = jax.random.PRNGKey(0)
    k_a, k_b = jax.random.split(key)
    # Case 1: GatedConv2d(4, 8, kernel_size=3, padding=1) — module defaults.
    _run_case(k_a, n=2, c_in=4, c_out=8, h=16, w=16, k=3, stride=1, pad=1, dil=1)
    # Case 2: dilation=2, padding=2, C_in=3 (exercises channel padding + dilation).
    _run_case(k_b, n=2, c_in=3, c_out=8, h=16, w=16, k=3, stride=1, pad=2, dil=2)
    print("KERNEL_OK")
</pallas_src>

<mosaic_0001>
module attributes {stable_mosaic.version = 11 : i64} {
  func.func @_gated_conv_flat_kernel(%arg0: i32, %arg1: memref<1x8x384xbf16, #tpu.memory_space<vmem>>, %arg2: memref<9x16x8xbf16, #tpu.memory_space<vmem>>, %arg3: memref<16x1xf32, #tpu.memory_space<vmem>>, %arg4: memref<1x8x288xf32, #tpu.memory_space<vmem>>) attributes {dimension_semantics = [#tpu.dimension_semantics<parallel>], iteration_bounds = array<i64: 2>, scalar_prefetch = 0 : i64, scratch_operands = 0 : i64, tpu.core_type = #tpu.core_type<tc>, window_params = [{transform_indices = @transform_0, window_bounds = array<i64: 1, 8, 384>}, {pipeline_mode = #tpu.pipeline_mode<synchronous>, transform_indices = @transform_1, window_bounds = array<i64: 9, 16, 8>}, {pipeline_mode = #tpu.pipeline_mode<synchronous>, transform_indices = @transform_2, window_bounds = array<i64: 16, 1>}, {transform_indices = @transform_3, window_bounds = array<i64: 1, 8, 288>}]} {
    %c0 = arith.constant 0 : index
    %c0_0 = arith.constant 0 : index
    %c0_1 = arith.constant 0 : index
    %0 = vector.load %arg1[%c0, %c0_0, %c0_1] : memref<1x8x384xbf16, #tpu.memory_space<vmem>>, vector<1x8x384xbf16>
    %1 = vector.shape_cast %0 : vector<1x8x384xbf16> to vector<8x384xbf16>
    %cst = arith.constant 0.000000e+00 : f32
    %2 = vector.broadcast %cst : f32 to vector<16x288xf32>
    %3 = vector.extract_strided_slice %1 {offsets = [0, 0], sizes = [8, 288], strides = [1, 1]} : vector<8x384xbf16> to vector<8x288xbf16>
    %c0_2 = arith.constant 0 : index
    %c0_3 = arith.constant 0 : index
    %c0_4 = arith.constant 0 : index
    %4 = vector.load %arg2[%c0_2, %c0_3, %c0_4] : memref<9x16x8xbf16, #tpu.memory_space<vmem>>, vector<1x16x8xbf16>
    %5 = vector.shape_cast %4 : vector<1x16x8xbf16> to vector<16x8xbf16>
    %cst_5 = arith.constant dense<0.000000e+00> : vector<16x288xf32>
    %6 = tpu.matmul %5, %3, %cst_5 {dimension_numbers = #tpu.dot_dimension_numbers<[1], [0], [0], [1], [0, 0, 1, 1], [], []>} : vector<16x8xbf16>, vector<8x288xbf16>, vector<16x288xf32> -> vector<16x288xf32>
    %7 = arith.addf %2, %6 : vector<16x288xf32>
    %8 = vector.extract_strided_slice %1 {offsets = [0, 1], sizes = [8, 288], strides = [1, 1]} : vector<8x384xbf16> to vector<8x288xbf16>
    %c1 = arith.constant 1 : index
    %c0_6 = arith.constant 0 : index
    %c0_7 = arith.constant 0 : index
    %9 = vector.load %arg2[%c1, %c0_6, %c0_7] : memref<9x16x8xbf16, #tpu.memory_space<vmem>>, vector<1x16x8xbf16>
    %10 = vector.shape_cast %9 : vector<1x16x8xbf16> to vector<16x8xbf16>
    %cst_8 = arith.constant dense<0.000000e+00> : vector<16x288xf32>
    %11 = tpu.matmul %10, %8, %cst_8 {dimension_numbers = #tpu.dot_dimension_numbers<[1], [0], [0], [1], [0, 0, 1, 1], [], []>} : vector<16x8xbf16>, vector<8x288xbf16>, vector<16x288xf32> -> vector<16x288xf32>
    %12 = arith.addf %7, %11 : vector<16x288xf32>
    %13 = vector.extract_strided_slice %1 {offsets = [0, 2], sizes = [8, 288], strides = [1, 1]} : vector<8x384xbf16> to vector<8x288xbf16>
    %c2 = arith.constant 2 : index
    %c0_9 = arith.constant 0 : index
    %c0_10 = arith.constant 0 : index
    %14 = vector.load %arg2[%c2, %c0_9, %c0_10] : memref<9x16x8xbf16, #tpu.memory_space<vmem>>, vector<1x16x8xbf16>
    %15 = vector.shape_cast %14 : vector<1x16x8xbf16> to vector<16x8xbf16>
    %cst_11 = arith.constant dense<0.000000e+00> : vector<16x288xf32>
    %16 = tpu.matmul %15, %13, %cst_11 {dimension_numbers = #tpu.dot_dimension_numbers<[1], [0], [0], [1], [0, 0, 1, 1], [], []>} : vector<16x8xbf16>, vector<8x288xbf16>, vector<16x288xf32> -> vector<16x288xf32>
    %17 = arith.addf %12, %16 : vector<16x288xf32>
    %18 = vector.extract_strided_slice %1 {offsets = [0, 18], sizes = [8, 288], strides = [1, 1]} : vector<8x384xbf16> to vector<8x288xbf16>
    %c3 = arith.constant 3 : index
    %c0_12 = arith.constant 0 : index
    %c0_13 = arith.constant 0 : index
    %19 = vector.load %arg2[%c3, %c0_12, %c0_13] : memref<9x16x8xbf16, #tpu.memory_space<vmem>>, vector<1x16x8xbf16>
    %20 = vector.shape_cast %19 : vector<1x16x8xbf16> to vector<16x8xbf16>
    %cst_14 = arith.constant dense<0.000000e+00> : vector<16x288xf32>
    %21 = tpu.matmul %20, %18, %cst_14 {dimension_numbers = #tpu.dot_dimension_numbers<[1], [0], [0], [1], [0, 0, 1, 1], [], []>} : vector<16x8xbf16>, vector<8x288xbf16>, vector<16x288xf32> -> vector<16x288xf32>
    %22 = arith.addf %17, %21 : vector<16x288xf32>
    %23 = vector.extract_strided_slice %1 {offsets = [0, 19], sizes = [8, 288], strides = [1, 1]} : vector<8x384xbf16> to vector<8x288xbf16>
    %c4 = arith.constant 4 : index
    %c0_15 = arith.constant 0 : index
    %c0_16 = arith.constant 0 : index
    %24 = vector.load %arg2[%c4, %c0_15, %c0_16] : memref<9x16x8xbf16, #tpu.memory_space<vmem>>, vector<1x16x8xbf16>
    %25 = vector.shape_cast %24 : vector<1x16x8xbf16> to vector<16x8xbf16>
    %cst_17 = arith.constant dense<0.000000e+00> : vector<16x288xf32>
    %26 = tpu.matmul %25, %23, %cst_17 {dimension_numbers = #tpu.dot_dimension_numbers<[1], [0], [0], [1], [0, 0, 1, 1], [], []>} : vector<16x8xbf16>, vector<8x288xbf16>, vector<16x288xf32> -> vector<16x288xf32>
    %27 = arith.addf %22, %26 : vector<16x288xf32>
    %28 = vector.extract_strided_slice %1 {offsets = [0, 20], sizes = [8, 288], strides = [1, 1]} : vector<8x384xbf16> to vector<8x288xbf16>
    %c5 = arith.constant 5 : index
    %c0_18 = arith.constant 0 : index
    %c0_19 = arith.constant 0 : index
    %29 = vector.load %arg2[%c5, %c0_18, %c0_19] : memref<9x16x8xbf16, #tpu.memory_space<vmem>>, vector<1x16x8xbf16>
    %30 = vector.shape_cast %29 : vector<1x16x8xbf16> to vector<16x8xbf16>
    %cst_20 = arith.constant dense<0.000000e+00> : vector<16x288xf32>
    %31 = tpu.matmul %30, %28, %cst_20 {dimension_numbers = #tpu.dot_dimension_numbers<[1], [0], [0], [1], [0, 0, 1, 1], [], []>} : vector<16x8xbf16>, vector<8x288xbf16>, vector<16x288xf32> -> vector<16x288xf32>
    %32 = arith.addf %27, %31 : vector<16x288xf32>
    %33 = vector.extract_strided_slice %1 {offsets = [0, 36], sizes = [8, 288], strides = [1, 1]} : vector<8x384xbf16> to vector<8x288xbf16>
    %c6 = arith.constant 6 : index
    %c0_21 = arith.constant 0 : index
    %c0_22 = arith.constant 0 : index
    %34 = vector.load %arg2[%c6, %c0_21, %c0_22] : memref<9x16x8xbf16, #tpu.memory_space<vmem>>, vector<1x16x8xbf16>
    %35 = vector.shape_cast %34 : vector<1x16x8xbf16> to vector<16x8xbf16>
    %cst_23 = arith.constant dense<0.000000e+00> : vector<16x288xf32>
    %36 = tpu.matmul %35, %33, %cst_23 {dimension_numbers = #tpu.dot_dimension_numbers<[1], [0], [0], [1], [0, 0, 1, 1], [], []>} : vector<16x8xbf16>, vector<8x288xbf16>, vector<16x288xf32> -> vector<16x288xf32>
    %37 = arith.addf %32, %36 : vector<16x288xf32>
    %38 = vector.extract_strided_slice %1 {offsets = [0, 37], sizes = [8, 288], strides = [1, 1]} : vector<8x384xbf16> to vector<8x288xbf16>
    %c7 = arith.constant 7 : index
    %c0_24 = arith.constant 0 : index
    %c0_25 = arith.constant 0 : index
    %39 = vector.load %arg2[%c7, %c0_24, %c0_25] : memref<9x16x8xbf16, #tpu.memory_space<vmem>>, vector<1x16x8xbf16>
    %40 = vector.shape_cast %39 : vector<1x16x8xbf16> to vector<16x8xbf16>
    %cst_26 = arith.constant dense<0.000000e+00> : vector<16x288xf32>
    %41 = tpu.matmul %40, %38, %cst_26 {dimension_numbers = #tpu.dot_dimension_numbers<[1], [0], [0], [1], [0, 0, 1, 1], [], []>} : vector<16x8xbf16>, vector<8x288xbf16>, vector<16x288xf32> -> vector<16x288xf32>
    %42 = arith.addf %37, %41 : vector<16x288xf32>
    %43 = vector.extract_strided_slice %1 {offsets = [0, 38], sizes = [8, 288], strides = [1, 1]} : vector<8x384xbf16> to vector<8x288xbf16>
    %c8 = arith.constant 8 : index
    %c0_27 = arith.constant 0 : index
    %c0_28 = arith.constant 0 : index
    %44 = vector.load %arg2[%c8, %c0_27, %c0_28] : memref<9x16x8xbf16, #tpu.memory_space<vmem>>, vector<1x16x8xbf16>
    %45 = vector.shape_cast %44 : vector<1x16x8xbf16> to vector<16x8xbf16>
    %cst_29 = arith.constant dense<0.000000e+00> : vector<16x288xf32>
    %46 = tpu.matmul %45, %43, %cst_29 {dimension_numbers = #tpu.dot_dimension_numbers<[1], [0], [0], [1], [0, 0, 1, 1], [], []>} : vector<16x8xbf16>, vector<8x288xbf16>, vector<16x288xf32> -> vector<16x288xf32>
    %47 = arith.addf %42, %46 : vector<16x288xf32>
    %c0_30 = arith.constant 0 : index
    %c0_31 = arith.constant 0 : index
    %48 = vector.load %arg3[%c0_30, %c0_31] : memref<16x1xf32, #tpu.memory_space<vmem>>, vector<16x1xf32>
    %49 = vector.broadcast %48 : vector<16x1xf32> to vector<16x288xf32>
    %50 = arith.addf %47, %49 : vector<16x288xf32>
    %51 = vector.extract_strided_slice %50 {offsets = [0, 0], sizes = [8, 288], strides = [1, 1]} : vector<16x288xf32> to vector<8x288xf32>
    %52 = vector.extract_strided_slice %50 {offsets = [8, 0], sizes = [8, 288], strides = [1, 1]} : vector<16x288xf32> to vector<8x288xf32>
    %53 = arith.negf %52 : vector<8x288xf32>
    %54 = math.exp %53 : vector<8x288xf32>
    %cst_32 = arith.constant 1.000000e+00 : f32
    %55 = vector.broadcast %cst_32 : f32 to vector<8x288xf32>
    %56 = arith.addf %55, %54 : vector<8x288xf32>
    %57 = arith.divf %55, %56 : vector<8x288xf32>
    %58 = arith.mulf %51, %57 : vector<8x288xf32>
    %cst_33 = arith.constant 2.000000e-01 : f32
    %59 = vector.broadcast %cst_33 : f32 to vector<8x288xf32>
    %60 = arith.mulf %59, %58 : vector<8x288xf32>
    %61 = arith.maximumf %58, %60 : vector<8x288xf32>
    %c0_34 = arith.constant 0 : index
    %c0_35 = arith.constant 0 : index
    %c0_36 = arith.constant 0 : index
    %62 = vector.load %arg4[%c0_34, %c0_35, %c0_36] : memref<1x8x288xf32, #tpu.memory_space<vmem>>, vector<1x8x288xf32>
    %63 = vector.shape_cast %62 : vector<1x8x288xf32> to vector<8x288xf32>
    %64 = vector.shape_cast %61 : vector<8x288xf32> to vector<1x8x288xf32>
    tpu.vector_store %arg4[%c0_34, %c0_35, %c0_36], %64 {strides = array<i32>} : memref<1x8x288xf32, #tpu.memory_space<vmem>>, vector<1x8x288xf32>,
    return
  }
  func.func @transform_0(%arg0: i32) -> (i32, i32, i32) {
    %c0_i32 = arith.constant 0 : i32
    %c0_i32_0 = arith.constant 0 : i32
    %c0_i32_1 = arith.constant 0 : i32
    return %arg0, %c0_i32, %c0_i32_0 : i32, i32, i32
  }
  func.func @transform_1(%arg0: i32) -> (i32, i32, i32) {
    %c0_i32 = arith.constant 0 : i32
    %c0_i32_0 = arith.constant 0 : i32
    %c0_i32_1 = arith.constant 0 : i32
    %c0_i32_2 = arith.constant 0 : i32
    return %c0_i32, %c0_i32_0, %c0_i32_1 : i32, i32, i32
  }
  func.func @transform_2(%arg0: i32) -> (i32, i32) {
    %c0_i32 = arith.constant 0 : i32
    %c0_i32_0 = arith.constant 0 : i32
    %c0_i32_1 = arith.constant 0 : i32
    return %c0_i32, %c0_i32_0 : i32, i32
  }
  func.func @transform_3(%arg0: i32) -> (i32, i32, i32) {
    %c0_i32 = arith.constant 0 : i32
    %c0_i32_0 = arith.constant 0 : i32
    %c0_i32_1 = arith.constant 0 : i32
    return %arg0, %c0_i32, %c0_i32_0 : i32, i32, i32
  }
}

</mosaic_0001>

<bundles_post_ra>
// kernel: gated_conv2d.1
= control target key start
LH: loop header
LB: loop body
LE: loop exit
PB: predicated region body
PF: predicated region fallthrough
CT: control target
= control target key end

     0   :  { %s1168_s12 = smov 0   ;;  %s1314_s0 = inlined_call_operand.vmem [shape: bf16[2,8,384], index: 0, kind: input, shape index: {}]   ;;  %s1315_s1 = inlined_call_operand.vmem [shape: bf16[9,16,8], index: 1, kind: input, shape index: {}]   ;;  %s1316_s2 = inlined_call_operand.vmem [shape: f32[16,1], index: 2, kind: input, shape index: {}]   ;;  %s1317_s3 = inlined_call_operand.vmem [shape: f32[2,8,288], index: 3, kind: output, shape index: {}]  }
   0x1 LB: > { %s998_s13 = sadd.s32 4294967295, %s1137_s12   ;;  %p1002_p0 = scmp.ge.s32.totalorder %s1137_s12, 1  ;;  %s1137_s12 = sphi %s1168_s12, %s13_s12  }
   0x2   : > { %p137_p1 = scmp.lt.s32.totalorder %s1137_s12, 3 }
   0x4   : > { %p138_p2 = pnand %p1002_p0, %p137_p1 }
   0x5   : > { %p161_p3 = scmp.lt.s32.totalorder (!%p138_p2), %s998_s13, 1  ;;  %s1139_s18 = smov (!%p138_p2), 127  }
   0x6   : > { %141 = sbr.rel (%p138_p2) target bundleno = 417 (0x1a1), region = 32  ;;  %s1140_s19 = smov (!%p138_p2), 126  }
   0x7   : > { %s1141_s20 = smov (!%p138_p2), 110   ;;  %s1142_s21 = smov (!%p138_p2), 109  }
   0x8   : > { %s1143_s22 = smov (!%p138_p2), 108   ;;  %s1144_s23 = smov (!%p138_p2), 92  }
   0x9   : > { %s1145_s24 = smov (!%p138_p2), 91   ;;  %s1146_s25 = smov (!%p138_p2), 90  }
   0xb   : > { %s1319_s13 = smov (!%p161_p3, %s998_s13), 1  ;;  %vm205_vm0 = vcmask 1043456   ;;  %v1196_v9 = vld [vmem:[%s1315_s1] sm:$0xff]  ;;  %vm201_vm1 = vcmask 64512   ;;  %vm330_vm2 = vcmask 1031168   ;;  %v1205_v14 = vld [vmem:[%s1315_s1 + $0x10] sm:$0xff] }
   0xc   : > { %s1098_s14 = smul.u32 12, %s1319_s13  ;;  %vm198_vm3 = vcmask 1039360   ;;  %v1090_v19 = vld [vmem:[%s1315_s1 + $0x8] sm:$0xff]  ;;  %vm407_vm4 = vcmask 900096   ;;  %v1092_v38 = vld [vmem:[%s1315_s1 + $0x18] sm:$0xff]  ;;  %vm484_vm5 = vcmask 891904  }
   0xd   : > { %vm561_vm6 = vcmask 883712   ;;  %v1094_v52 = vld [vmem:[%s1315_s1 + $0x28] sm:$0xff]  ;;  %vm638_vm7 = vcmask 752640   ;;  %vm715_vm8 = vcmask 744448   ;;  %vm792_vm9 = vcmask 736256  }
   0xe   : > { %s165_s17 = scalar_lea.vmem %s1314_s0, %s1098_s14 }
   0xf   : > { %v173_v0 = vld [vmem:[%s165_s17 + $0x8] sm:$0xf]  ;;  %v172_v1 = vld [vmem:[%s165_s17] sm:$0xff] }
  0x10   : > { %v188_v2 = vunpack.c.l.b16 %v173_v0  ;;  %v187_v3 = vunpack.c.h.b16 %v172_v1  ;;  %v186_v6 = vunpack.c.l.b16 %v172_v1 }
  0x12   : > { %v191_v4 = vpack.c.b16 %v188_v2, %v188_v2  ;;  %v1182_v5 = vpack.c.b16 %v187_v3, %v187_v3  ;;  %v189_v7 = vpack.c.b16 %v186_v6, %v186_v6  ;;  %v1093_v2 = vld [vmem:[%s1315_s1 + $0x20] sm:$0xff]  ;;  %v1095_v6 = vld [vmem:[%s1315_s1 + $0x30] sm:$0xff] }
  0x14   : > { %196 = vrot.lane.b32.xlu0 %v191_v4, %s1139_s18  ;;  %194 = vrot.lane.b32.xlu1 %v1182_v5, %s1139_s18  ;;  %v266_v8 = vsel %vm205_vm0, %v189_v7, 0  ;;  %v272_v20 = vsel %vm205_vm0, %v191_v4, 0  ;;  %v269_v26 = vsel %vm205_vm0, %v1182_v5, 0 }
  0x15   : > { %326 = vrot.lane.b32.xlu2 %v1182_v5, %s1140_s19  ;;  %281 = vmatpush.bf16.msra.mxu3 %v266_v8 }
  0x18   : > { %1018 = vmatmul.msk.bf16.vlgmr.msra.gmra.mxu3 %vm201_vm1, %v1196_v9 }
  0x1c   : > { %324 = vrot.lane.b32.xlu1 %v189_v7, %s1140_s19  ;;  %192 = vrot.lane.b32.xlu0 %v189_v7, %s1139_s18 }
  0x1d   : > { %328 = vrot.lane.b32.xlu2 %v191_v4, %s1140_s19 }
  0x24   : > { %405 = vrot.lane.b32.xlu1 %v191_v4, %s1141_s20  ;;  %403 = vrot.lane.b32.xlu0 %v1182_v5, %s1141_s20 }
  0x25   : > { %401 = vrot.lane.b32.xlu2 %v189_v7, %s1141_s20 }
  0x2c   : > { %478 = vrot.lane.b32.xlu1 %v189_v7, %s1142_s21  ;;  %482 = vrot.lane.b32.xlu0 %v191_v4, %s1142_s21 }
  0x2d   : > { %480 = vrot.lane.b32.xlu2 %v1182_v5, %s1142_s21 }
  0x34   : > { %557 = vrot.lane.b32.xlu1 %v1182_v5, %s1143_s22  ;;  %555 = vrot.lane.b32.xlu0 %v189_v7, %s1143_s22 }
  0x35   : > { %632 = vrot.lane.b32.xlu2 %v189_v7, %s1144_s23 }
  0x3c   : > { %559 = vrot.lane.b32.xlu1 %v191_v4, %s1143_s22  ;;  %634 = vrot.lane.b32.xlu0 %v1182_v5, %s1144_s23 }
  0x3d   : > { %636 = vrot.lane.b32.xlu2 %v191_v4, %s1144_s23  ;;  %s1099_s23 = smul.u32 24, %s1319_s13 }
  0x44   : > { %713 = vrot.lane.b32.xlu1 %v191_v4, %s1145_s24  ;;  %711 = vrot.lane.b32.xlu0 %v1182_v5, %s1145_s24 }
  0x45   : > { %709 = vrot.lane.b32.xlu2 %v189_v7, %s1145_s24 }
  0x4c   : > { %790 = vrot.lane.b32.xlu0 %v191_v4, %s1146_s25  ;;  %786 = vrot.lane.b32.xlu1 %v189_v7, %s1146_s25 }
  0x4d   : > { %788 = vrot.lane.b32.xlu2 %v1182_v5, %s1146_s25  ;;  %s170_s25 = scalar_lea.vmem %s1317_s3, %s1099_s23 }
  0x6f   : > { %v327_v10 = vpop.permute.xlu2 %326 }
  0x77   : > { %v329_v11 = vpop.permute.xlu2 %328 }
  0x78   : > { %v332_v12 = vsel %vm330_vm2, %v327_v10, %v329_v11  ;;  %v343_v29 = vsel %vm205_vm0, %v329_v11, 0 }
  0x79   : > { %v340_v13 = vsel %vm205_vm0, %v332_v12, 0 }
  0x7a   : > { %366 = vmatpush.bf16.msrb.mxu3 %v340_v13  ;;  %v1096_v13 = vld [vmem:[%s1315_s1 + $0x38] sm:$0xff] }
  0x7d   : > { %1028 = vmatmul.msk.bf16.vlgmr.msrb.gmra.mxu3 %vm201_vm1, %v1205_v14 }
  0x7f   : > { %v402_v30 = vpop.permute.xlu2 %401 }
  0x86   : > { %v197_v15 = vpop.permute.xlu0 %196  ;;  %v195_v16 = vpop.permute.xlu1 %194 }
  0x87   : > { %v213_v17 = vsel %vm205_vm0, %v197_v15, 0  ;;  %v200_v18 = vsel %vm198_vm3, %v195_v16, %v197_v15  ;;  %v481_v39 = vpop.permute.xlu2 %480 }
  0x88   : > { %250 = vmatpush.bf16.msra.mxu2 %v213_v17  ;;  %v210_v21 = vsel %vm205_vm0, %v200_v18, 0 }
  0x89   : > { %236 = vmatpush.bf16.msra.mxu1 %v210_v21  ;;  %v1147_v21 = vmov 0  }
  0x8a   : > { %1118 = vset.pattern.permute.xlu1 %v1147_v21  ;;  %1117 = vset.pattern.permute.xlu0 %v1147_v21 }
  0x8b   : > { %1013 = vmatmul.msk.bf16.vlgmr.msra.gmra.mxu2 %vm201_vm1, %v1090_v19 }
  0x8c   : > { %1012 = vmatmul.msk.bf16.vlgmr.msra.gmra.mxu1 %vm201_vm1, %v1090_v19 }
  0x8d   : > { %309 = vmatpush.bf16.msrb.mxu1 %v272_v20  ;;  %v856_v20 = vld [vmem:[%s1316_s2 + $0x8] sm:$0xff] }
  0x8e   : > { %v325_v22 = vpop.permute.xlu1 %324  ;;  %v193_v23 = vpop.permute.xlu0 %192  ;;  %864 = vperm.xlu0 %1117, %v856_v20  }
  0x8f   : > { %v199_v24 = vsel %vm198_vm3, %v193_v23, %v195_v16  ;;  %v331_v25 = vsel %vm330_vm2, %v325_v22, %v327_v10  ;;  %v633_v47 = vpop.permute.xlu2 %632  ;;  %v1097_v22 = vld [vmem:[%s1315_s1 + $0x40] sm:$0xff] }
  0x90   : > { %v207_v27 = vsel %vm205_vm0, %v199_v24, 0  ;;  %v337_v28 = vsel %vm205_vm0, %v331_v25, 0 }
  0x91   : > { %222 = vmatpush.bf16.msra.mxu0 %v207_v27  ;;  %352 = vmatpush.bf16.msrb.mxu2 %v337_v28 }
  0x94   : > { %1011 = vmatmul.msk.bf16.vlgmr.msra.gmra.mxu0 %vm201_vm1, %v1090_v19  ;;  %v855_v19 = vld [vmem:[%s1316_s2] sm:$0xff] }
  0x95   : > { %295 = vmatpush.bf16.msrb.mxu0 %v269_v26  ;;  %859 = vperm.xlu1 %1118, %v855_v19  }
  0x96   : > { %v406_v31 = vpop.permute.xlu1 %405  ;;  %v404_v32 = vpop.permute.xlu0 %403 }
  0x97   : > { %v420_v33 = vsel %vm205_vm0, %v406_v31, 0  ;;  %v408_v34 = vsel %vm407_vm4, %v402_v30, %v404_v32  ;;  %v409_v35 = vsel %vm407_vm4, %v404_v32, %v406_v31  ;;  %v637_v53 = vpop.permute.xlu2 %636 }
  0x98   : > { %v414_v36 = vsel %vm205_vm0, %v408_v34, 0  ;;  %v417_v37 = vsel %vm205_vm0, %v409_v35, 0  ;;  %457 = vmatpush.bf16.msra.mxu3 %v420_v33 }
  0x99   : > { %380 = vmatpush.bf16.msra.mxu0 %v343_v29  ;;  %429 = vmatpush.bf16.msra.mxu1 %v414_v36 }
  0x9a   : > { %443 = vmatpush.bf16.msra.mxu2 %v417_v37 }
  0x9b   : > { %1027 = vmatmul.msk.bf16.vlgmr.msrb.gmra.mxu2 %vm201_vm1, %v1205_v14  ;;  %1038 = vmatmul.msk.bf16.vlgmr.msra.gmra.mxu3 %vm201_vm1, %v1092_v38  ;;  %v283_v23 = vpop.f32.mrf.mxu3 }
  0x9c   : > { %1020 = vmatmul.msk.bf16.vlgmr.msrb.gmra.mxu1 %vm201_vm1, %v1196_v9 }
  0x9e   : > { %v479_v40 = vpop.permute.xlu1 %478  ;;  %v483_v41 = vpop.permute.xlu0 %482 }
  0x9f   : > { %v485_v42 = vsel %vm484_vm5, %v479_v40, %v481_v39  ;;  %v486_v43 = vsel %vm484_vm5, %v481_v39, %v483_v41  ;;  %v497_v44 = vsel %vm205_vm0, %v483_v41, 0  ;;  %v710_v63 = vpop.permute.xlu2 %709 }
  0xa0   : > { %v494_v45 = vsel %vm205_vm0, %v486_v43, 0  ;;  %534 = vmatpush.bf16.msrb.mxu2 %v497_v44  ;;  %v491_v46 = vsel %vm205_vm0, %v485_v42, 0 }
  0xa1   : > { %520 = vmatpush.bf16.msrb.mxu1 %v494_v45 }
  0xa3   : > { %v285_v26 = vpop.f32.mrf.mxu3 }
  0xa4   : > { %1019 = vmatmul.msk.bf16.vlgmr.msrb.gmra.mxu0 %vm201_vm1, %v1196_v9  ;;  %v651_v9 = vsel %vm205_vm0, %v637_v53, 0 }
  0xa5   : > { %506 = vmatpush.bf16.msrb.mxu0 %v491_v46 }
  0xa6   : > { %v558_v48 = vpop.permute.xlu1 %557  ;;  %v556_v49 = vpop.permute.xlu0 %555 }
  0xa7   : > { %v562_v50 = vsel %vm561_vm6, %v556_v49, %v558_v48  ;;  %v789_v10 = vpop.permute.xlu2 %788 }
  0xa8   : > { %v568_v51 = vsel %vm205_vm0, %v562_v50, 0 }
  0xa9   : > { %583 = vmatpush.bf16.msrb.mxu3 %v568_v51 }
  0xab   : > { %1037 = vmatmul.msk.bf16.vlgmr.msra.gmra.mxu2 %vm201_vm1, %v1092_v38 }
  0xac   : > { %1036 = vmatmul.msk.bf16.vlgmr.msra.gmra.mxu1 %vm201_vm1, %v1092_v38  ;;  %1054 = vmatmul.msk.bf16.vlgmr.msrb.gmra.mxu3 %vm201_vm1, %v1094_v52 }
  0xae   : > { %v560_v54 = vpop.permute.xlu1 %559  ;;  %v635_v55 = vpop.permute.xlu0 %634 }
  0xaf   : > { %v563_v56 = vsel %vm561_vm6, %v558_v48, %v560_v54  ;;  %v574_v57 = vsel %vm205_vm0, %v560_v54, 0  ;;  %v639_v58 = vsel %vm638_vm7, %v633_v47, %v635_v55  ;;  %v640_v59 = vsel %vm638_vm7, %v635_v55, %v637_v53 }
  0xb0   : > { %v645_v60 = vsel %vm205_vm0, %v639_v58, 0  ;;  %v648_v61 = vsel %vm205_vm0, %v640_v59, 0  ;;  %611 = vmatpush.bf16.msra.mxu1 %v574_v57  ;;  %v571_v62 = vsel %vm205_vm0, %v563_v56, 0  ;;  %vm941_vm6 = vcmask 261120  }
  0xb1   : > { %660 = vmatpush.bf16.msra.mxu2 %v645_v60  ;;  %674 = vmatpush.bf16.msra.mxu3 %v648_v61 }
  0xb4   : > { %1029 = vmatmul.msk.bf16.vlgmr.msra.gmra.mxu0 %vm201_vm1, %v1205_v14 }
  0xb5   : > { %597 = vmatpush.bf16.msra.mxu0 %v571_v62 }
  0xb6   : > { %v714_v0 = vpop.permute.xlu1 %713  ;;  %v712_v1 = vpop.permute.xlu0 %711 }
  0xb7   : > { %v728_v3 = vsel %vm205_vm0, %v714_v0, 0  ;;  %v716_v4 = vsel %vm715_vm8, %v710_v63, %v712_v1  ;;  %v717_v5 = vsel %vm715_vm8, %v712_v1, %v714_v0 }
  0xb8   : > { %765 = vmatpush.bf16.msrb.mxu3 %v728_v3  ;;  %v722_v7 = vsel %vm205_vm0, %v716_v4, 0  ;;  %v725_v8 = vsel %vm205_vm0, %v717_v5, 0 }
  0xbb   : > { %1047 = vmatmul.msk.bf16.vlgmr.msrb.gmra.mxu2 %vm201_vm1, %v1093_v2 }
  0xbc   : > { %1046 = vmatmul.msk.bf16.vlgmr.msrb.gmra.mxu1 %vm201_vm1, %v1093_v2  ;;  %1064 = vmatmul.msk.bf16.vlgmr.msra.gmra.mxu3 %vm201_vm1, %v1095_v6 }
  0xbd   : > { %737 = vmatpush.bf16.msrb.mxu1 %v722_v7  ;;  %751 = vmatpush.bf16.msrb.mxu2 %v725_v8 }
  0xbe   : > { %v791_v11 = vpop.permute.xlu0 %790  ;;  %v787_v16 = vpop.permute.xlu1 %786 }
  0xbf   : > { %v794_v12 = vsel %vm792_vm9, %v789_v10, %v791_v11  ;;  %v805_v15 = vsel %vm205_vm0, %v791_v11, 0  ;;  %v793_v17 = vsel %vm792_vm9, %v787_v16, %v789_v10 }
  0xc0   : > { %v802_v14 = vsel %vm205_vm0, %v794_v12, 0  ;;  %v799_v18 = vsel %vm205_vm0, %v793_v17, 0 }
  0xc4   : > { %1045 = vmatmul.msk.bf16.vlgmr.msrb.gmra.mxu0 %vm201_vm1, %v1093_v2 }
  0xc5   : > { %688 = vmatpush.bf16.msrb.mxu0 %v651_v9 }
  0xcb   : > { %1063 = vmatmul.msk.bf16.vlgmr.msra.gmra.mxu2 %vm201_vm1, %v1095_v6 }
  0xcc   : > { %1056 = vmatmul.msk.bf16.vlgmr.msra.gmra.mxu1 %vm201_vm1, %v1094_v52  ;;  %1074 = vmatmul.msk.bf16.vlgmr.msrb.gmra.mxu3 %vm201_vm1, %v1096_v13 }
  0xcd   : > { %842 = vmatpush.bf16.msra.mxu2 %v805_v15  ;;  %828 = vmatpush.bf16.msra.mxu1 %v802_v14 }
  0xd4   : > { %1055 = vmatmul.msk.bf16.vlgmr.msra.gmra.mxu0 %vm201_vm1, %v1094_v52 }
  0xd5   : > { %814 = vmatpush.bf16.msra.mxu0 %v799_v18 }
  0xdb   : > { %1073 = vmatmul.msk.bf16.vlgmr.msrb.gmra.mxu2 %vm201_vm1, %v1096_v13 }
  0xdc   : > { %1072 = vmatmul.msk.bf16.vlgmr.msrb.gmra.mxu1 %vm201_vm1, %v1096_v13 }
  0xe4   : > { %1065 = vmatmul.msk.bf16.vlgmr.msrb.gmra.mxu0 %vm201_vm1, %v1095_v6 }
  0xeb   : > { %1083 = vmatmul.msk.bf16.vlgmr.msra.gmra.mxu2 %vm201_vm1, %v1097_v22 }
  0xec   : > { %1082 = vmatmul.msk.bf16.vlgmr.msra.gmra.mxu1 %vm201_vm1, %v1097_v22 }
  0xf4   : > { %1081 = vmatmul.msk.bf16.vlgmr.msra.gmra.mxu0 %vm201_vm1, %v1097_v22 }
 0x100   : > { %v368_v31 = vpop.f32.mrf.mxu3 }
 0x108   : > { %v370_v42 = vpop.f32.mrf.mxu3 }
 0x109   : > { %v238_v24 = vpop.f32.mrf.mxu1 }
 0x10e   : > { %v252_v25 = vpop.f32.mrf.mxu2 }
 0x111   : > { %v224_v27 = vpop.f32.mrf.mxu0  ;;  %v240_v28 = vpop.f32.mrf.mxu1 }
 0x112   : > { %v284_v29 = vadd.f32 %v283_v23, %v224_v27 }
 0x116   : > { %v254_v30 = vpop.f32.mrf.mxu2 }
 0x119   : > { %v226_v32 = vpop.f32.mrf.mxu0  ;;  %v311_v33 = vpop.f32.mrf.mxu1 }
 0x11a   : > { %v286_v34 = vadd.f32 %v285_v26, %v226_v32  ;;  %v312_v35 = vadd.f32 %v311_v33, %v252_v25 }
 0x11e   : > { %v354_v36 = vpop.f32.mrf.mxu2  ;;  %v459_v49 = vpop.f32.mrf.mxu3 }
 0x11f   : > { %v387_v37 = vadd.f32 %v354_v36, %v284_v29 }
 0x121   : > { %v297_v38 = vpop.f32.mrf.mxu0  ;;  %v313_v39 = vpop.f32.mrf.mxu1 }
 0x122   : > { %v298_v40 = vadd.f32 %v297_v38, %v238_v24  ;;  %v314_v41 = vadd.f32 %v313_v39, %v254_v30 }
 0x124   : > { %v388_v43 = vadd.f32 %v368_v31, %v298_v40 }
 0x126   : > { %v356_v44 = vpop.f32.mrf.mxu2  ;;  %v461_v57 = vpop.f32.mrf.mxu3 }
 0x127   : > { %v390_v45 = vadd.f32 %v356_v44, %v286_v34 }
 0x129   : > { %v299_v46 = vpop.f32.mrf.mxu0  ;;  %v431_v47 = vpop.f32.mrf.mxu1 }
 0x12a   : > { %v464_v48 = vadd.f32 %v431_v47, %v387_v37  ;;  %v300_v19 = vadd.f32 %v299_v46, %v240_v28  ;;  %v865_v28 = vpop.permute.xlu0 %864 }
 0x12c   : > { %v391_v22 = vadd.f32 %v370_v42, %v300_v19 }
 0x12e   : > { %v445_v50 = vpop.f32.mrf.mxu2 }
 0x12f   : > { %v465_v51 = vadd.f32 %v445_v50, %v388_v43  ;;  %v585_v63 = vpop.f32.mrf.mxu3 }
 0x131   : > { %v382_v52 = vpop.f32.mrf.mxu0  ;;  %v433_v53 = vpop.f32.mrf.mxu1 }
 0x132   : > { %v389_v54 = vadd.f32 %v382_v52, %v312_v35  ;;  %v467_v34 = vadd.f32 %v433_v53, %v390_v45 }
 0x134   : > { %v466_v55 = vadd.f32 %v459_v49, %v389_v54 }
 0x136   : > { %v447_v56 = vpop.f32.mrf.mxu2 }
 0x137   : > { %v587_v8 = vpop.f32.mrf.mxu3  ;;  %v468_v23 = vadd.f32 %v447_v56, %v391_v22 }
 0x139   : > { %v384_v58 = vpop.f32.mrf.mxu0  ;;  %v522_v59 = vpop.f32.mrf.mxu1 }
 0x13a   : > { %v1292_v60 = vadd.f32 %v522_v59, %v465_v51  ;;  %v392_v25 = vadd.f32 %v384_v58, %v314_v41 }
 0x13c   : > { %v469_v32 = vadd.f32 %v461_v57, %v392_v25 }
 0x13e   : > { %v536_v61 = vpop.f32.mrf.mxu2 }
 0x13f   : > { %v543_v62 = vadd.f32 %v536_v61, %v466_v55  ;;  %v676_v13 = vpop.f32.mrf.mxu3 }
 0x141   : > { %v508_v0 = vpop.f32.mrf.mxu0  ;;  %v524_v1 = vpop.f32.mrf.mxu1 }
 0x142   : > { %v541_v2 = vadd.f32 %v508_v0, %v464_v48  ;;  %v545_v26 = vadd.f32 %v524_v1, %v468_v23 }
 0x144   : > { %v618_v3 = vadd.f32 %v585_v63, %v541_v2 }
 0x146   : > { %v538_v4 = vpop.f32.mrf.mxu2 }
 0x147   : > { %v678_v17 = vpop.f32.mrf.mxu3  ;;  %v546_v33 = vadd.f32 %v538_v4, %v469_v32 }
 0x149   : > { %v510_v5 = vpop.f32.mrf.mxu0  ;;  %v613_v6 = vpop.f32.mrf.mxu1 }
 0x14a   : > { %v1294_v7 = vadd.f32 %v613_v6, %v543_v62  ;;  %v544_v38 = vadd.f32 %v510_v5, %v467_v34 }
 0x14c   : > { %v621_v46 = vadd.f32 %v587_v8, %v544_v38 }
 0x14e   : > { %v662_v9 = vpop.f32.mrf.mxu2 }
 0x14f   : > { %v1296_v10 = vadd.f32 %v662_v9, %v618_v3  ;;  %v767_v27 = vpop.f32.mrf.mxu3 }
 0x151   : > { %v599_v11 = vpop.f32.mrf.mxu0  ;;  %v615_v12 = vpop.f32.mrf.mxu1 }
 0x152   : > { %v623_v37 = vadd.f32 %v615_v12, %v546_v33  ;;  %v619_v63 = vadd.f32 %v599_v11, %v1292_v60 }
 0x154   : > { %v696_v3 = vadd.f32 %v676_v13, %v619_v63 }
 0x156   : > { %v664_v14 = vpop.f32.mrf.mxu2 }
 0x157   : > { %v769_v44 = vpop.f32.mrf.mxu3  ;;  %v698_v49 = vadd.f32 %v664_v14, %v621_v46 }
 0x159   : > { %v601_v15 = vpop.f32.mrf.mxu0  ;;  %v1298_v16 = vpop.f32.mrf.mxu1 }
 0x15a   : > { %v622_v31 = vadd.f32 %v601_v15, %v545_v26  ;;  %v772_v11 = vadd.f32 %v1298_v16, %v1296_v10 }
 0x15c   : > { %v699_v35 = vadd.f32 %v678_v17, %v622_v31  ;;  %v860_v17 = vpop.permute.xlu1 %859 }
 0x15e   : > { %v753_v18 = vpop.f32.mrf.mxu2 }
 0x15f   : > { %v773_v6 = vadd.f32 %v753_v18, %v696_v3 }
 0x161   : > { %v690_v20 = vpop.f32.mrf.mxu0  ;;  %v741_v21 = vpop.f32.mrf.mxu1 }
 0x162   : > { %v775_v45 = vadd.f32 %v741_v21, %v698_v49  ;;  %v697_v8 = vadd.f32 %v690_v20, %v1294_v7 }
 0x164   : > { %v774_v13 = vadd.f32 %v767_v27, %v697_v8 }
 0x166   : > { %v755_v24 = vpop.f32.mrf.mxu2 }
 0x167   : > { %v776_v39 = vadd.f32 %v755_v24, %v699_v35 }
 0x169   : > { %v692_v29 = vpop.f32.mrf.mxu0  ;;  %v830_v30 = vpop.f32.mrf.mxu1 }
 0x16a   : > { %v700_v40 = vadd.f32 %v692_v29, %v623_v37  ;;  %v850_v12 = vadd.f32 %v830_v30, %v773_v6 }
 0x16c   : > { %v777_v48 = vadd.f32 %v769_v44, %v700_v40  ;;  %v868_v23 = vadd.f32 %v860_v17, %v850_v12 }
 0x16e   : > { %v844_v36 = vpop.f32.mrf.mxu2 }
 0x16f   : > { %v851_v25 = vadd.f32 %v844_v36, %v774_v13 }
 0x171   : > { %v1300_v43 = vpop.f32.mrf.mxu0  ;;  %v832_v42 = vpop.f32.mrf.mxu1 }
 0x172   : > { %v853_v41 = vadd.f32 %v832_v42, %v776_v39  ;;  %v849_v10 = vadd.f32 %v1300_v43, %v772_v11  ;;  %v869_v39 = vadd.f32 %v860_v17, %v851_v25 }
 0x174   : > { %v871_v47 = vadd.f32 %v865_v28, %v853_v41  ;;  %v867_v46 = vadd.f32 %v860_v17, %v849_v10 }
 0x176   : > { %v1085_v50 = vmul.f32 -1.442695, %v871_v47  ;;  %v846_v51 = vpop.f32.mrf.mxu2 }
 0x177   : > { %v854_v52 = vadd.f32 %v846_v51, %v777_v48 }
 0x178   : > { %1119 = vpow2.f32 %v1085_v50 }
 0x179   : > { %v872_v53 = vadd.f32 %v865_v28, %v854_v52  ;;  %v818_v54 = vpop.f32.mrf.mxu0 }
 0x17a   : > { %v852_v55 = vadd.f32 %v818_v54, %v775_v45 }
 0x17b   : > { %v1086_v56 = vmul.f32 -1.442695, %v872_v53 }
 0x17c   : > { %v870_v57 = vadd.f32 %v865_v28, %v852_v55 }
 0x17d   : > { %1121 = vpow2.f32 %v1086_v56 }
 0x17e   : > { %v1120_v58 = vpop.eup %1119  ;;  %v1084_v59 = vmul.f32 -1.442695, %v870_v57 }
 0x17f   : > { %v883_v61 = vadd.f32 1.0, %v1120_v58 }
 0x180   : > { %1123 = vpow2.f32 %v1084_v59 }
 0x181   : > { %1125 = vrcp.f32 %v883_v61  ;;  %v911_v14 = vand.u32 2147483648, %v883_v61  ;;  %v909_v21 = vand.u32 2147483647, %v883_v61  ;;  %vm905_vm11 = vweird.f32 %v883_v61 }
 0x183   : > { %v1122_v62 = vpop.eup %1121  ;;  %v912_v7 = vor.u32 1.1754944e-38, %v911_v14  ;;  %vm910_vm13 = vcmp.eq.f32.partialorder %v909_v21, 8.507059e+37 }
 0x184   : > { %v884_v0 = vadd.f32 1.0, %v1122_v62 }
 0x186   : > { %v1124_v1 = vpop.eup %1123  ;;  %1127 = vrcp.f32 %v884_v0  ;;  %v926_v24 = vand.u32 2147483648, %v884_v0  ;;  %v924_v32 = vand.u32 2147483647, %v884_v0  ;;  %vm920_vm15 = vweird.f32 %v884_v0 }
 0x187   : > { %v1126_v2 = vpop.eup %1125  ;;  %v882_v4 = vadd.f32 1.0, %v1124_v1 }
 0x188   : > { %v901_v5 = vmul.f32 %v1126_v2, %v883_v61  ;;  %vm906_vm10 = vweird.f32 %v1126_v2  ;;  %v927_v34 = vor.u32 1.1754944e-38, %v926_v24  ;;  %vm925_vm2 = vcmp.eq.f32.partialorder %v924_v32, 8.507059e+37 }
 0x189   : > { %1129 = vrcp.f32 %v882_v4  ;;  %vm907_vm12 = vmor %vm905_vm11, %vm906_vm10  ;;  %v896_v35 = vand.u32 2147483648, %v882_v4  ;;  %v894_v36 = vand.u32 2147483647, %v882_v4  ;;  %vm890_vm3 = vweird.f32 %v882_v4 }
 0x18a   : > { %v902_v9 = vsub.f32 1.0, %v901_v5 }
 0x18b   : > { %v897_v41 = vor.u32 1.1754944e-38, %v896_v35  ;;  %vm895_vm5 = vcmp.eq.f32.partialorder %v894_v36, 8.507059e+37 }
 0x18c   : > { %v1128_v15 = vpop.eup %1127  ;;  %v903_v19 = vmul.f32 %v1126_v2, %v902_v9 }
 0x18d   : > { %v916_v60 = vmul.f32 %v1128_v15, %v884_v0  ;;  %vm921_vm14 = vweird.f32 %v1128_v15 }
 0x18e   : > { %v904_v22 = vadd.f32 %v1126_v2, %v903_v19  ;;  %vm922_vm0 = vmor %vm920_vm15, %vm921_vm14 }
 0x18f   : > { %v1130_v18 = vpop.eup %1129  ;;  %v917_v20 = vsub.f32 1.0, %v916_v60 }
 0x190   : > { %v908_v26 = vsel %vm907_vm12, %v1126_v2, %v904_v22  ;;  %v886_v29 = vmul.f32 %v1130_v18, %v882_v4  ;;  %vm891_vm1 = vweird.f32 %v1130_v18 }
 0x191   : > { %v913_v30 = vsel %vm910_vm13, %v912_v7, %v908_v26  ;;  %v918_v31 = vmul.f32 %v1128_v15, %v917_v20  ;;  %vm892_vm4 = vmor %vm890_vm3, %vm891_vm1 }
 0x192   : > { %v931_v16 = vmul.f32 %v913_v30, %v868_v23  ;;  %v887_v27 = vsub.f32 1.0, %v886_v29 }
 0x193   : > { %v919_v33 = vadd.f32 %v1128_v15, %v918_v31 }
 0x194   : > { %v934_v37 = vmul.f32 0.2, %v931_v16  ;;  %v888_v38 = vmul.f32 %v1130_v18, %v887_v27 }
 0x195   : > { %v923_v28 = vsel %vm922_vm0, %v1128_v15, %v919_v33 }
 0x196   : > { %v937_v40 = vmax.f32 %v931_v16, %v934_v37  ;;  %v928_v43 = vsel %vm925_vm2, %v927_v34, %v923_v28  ;;  %v889_v42 = vadd.f32 %v1130_v18, %v888_v38 }
 0x197   : > { %v932_v44 = vmul.f32 %v928_v43, %v869_v39 }
 0x198   : > { %940 = vst [vmem:[%s170_s25 + $0x8] sm:$0xff] %v937_v40  ;;  %v893_v47 = vsel %vm892_vm4, %v1130_v18, %v889_v42 }
 0x199   : > { %v935_v48 = vmul.f32 0.2, %v932_v44  ;;  %v898_v49 = vsel %vm895_vm5, %v897_v41, %v893_v47 }
 0x19a   : > { %v930_v50 = vmul.f32 %v898_v49, %v867_v46 }
 0x19b   : > { %v938_v51 = vmax.f32 %v932_v44, %v935_v48 }
 0x19c   : > { %v933_v52 = vmul.f32 0.2, %v930_v50 }
 0x19d   : > { %942 = vst.msk [vmem:[%s170_s25 + $0x10] sm:$0xff] %vm941_vm6, %v938_v51 }
 0x19e   : > { %v936_v45 = vmax.f32 %v930_v50, %v933_v52 }
 0x1a0   : > { %939 = vst [vmem:[%s170_s25] sm:$0xff] %v936_v45 }
 0x1a1 PF: > { %s13_s12 = sadd.s32 1, %s1137_s12  }
 0x1a2   : > { %p10_p4 = scmp.ge.s32.totalorder %s13_s12, 4  }
 0x1a4   :  { %12 = sbr.rel (!%p10_p4) target bundleno = 1 (0x1), region = 70 }

</bundles_post_ra>
